<compile_context>
chip_gen: v7x
topology: tpu7x:2x2x1
jax: 0.10.0
libtpu: 0.0.40
codegen_flags: <defaults>
</compile_context>

<pallas_src>
import functools

import jax
import jax.numpy as jnp
from jax import lax
from jax.experimental import pallas as pl
from jax.experimental.pallas import tpu as pltpu

K = 3
CONFIG = {
    "batch_size": 2,            # small demo batch
    "d_model": 32,
    "n_heads": 8,
    "context_window": K ** 2,   # 9
    "vocab_size": 64,           # synthetic vocab (not in the original config dict)
}

_LANE = 128
_SUBLANE = 8


def _fused_kernel(idx_ref, emb_ref, scale_ref, sel_ref, w1_ref, b1_ref, w2_ref, b2_ref,
                  out_ref, *, inv_tde):
    """Single step: all (padded) B*T tokens at once; everything is plain 2-D, no reshapes.

    idx_ref:   (Np, 1)  int32  flattened+padded token ids (pad id == V -> all-zero one-hot row)
    emb_ref:   (V, D)   f32    embedding table (VMEM resident)
    scale_ref: (Np, D)  f32    RMSNorm scale tiled per sample (zeros on pad rows)
    sel_ref:   (Np, Np) f32    same-sample selector (sel[i,j]==1 iff rows i,j share a sample)
    w1_ref:    (D, D), b1_ref: (1, D)
    w2_ref:    (D, Vp), b2_ref: (1, Vp)   vocab zero-padded to lane-dense Vp (multiple of 128)
    out_ref:   (Np, Vp) f32
    """
    ids = idx_ref[...]                                                     # (Np, 1)
    Np = ids.shape[0]
    V, D = emb_ref.shape

    # Fused embedding gather: exact row-select via one-hot matmul on the MXU.
    onehot = (lax.broadcasted_iota(jnp.int32, (Np, V), 1) == ids).astype(jnp.float32)
    x = jnp.dot(onehot, emb_ref[...], preferred_element_type=jnp.float32)  # (Np, D)

    # Per-sample sum of squares broadcast back to every row of that sample in one small
    # MXU matmul; pad rows are zero so they contribute nothing (and read a finite sum,
    # so no NaN/Inf ever enters the later matmuls).
    xsq = x * x
    batch_sq = jnp.dot(sel_ref[...], xsq, preferred_element_type=jnp.float32)  # (Np, D)
    sumsq = jnp.sum(batch_sq, axis=1, keepdims=True)                           # (Np, 1)
    inv_rms = lax.rsqrt(sumsq * inv_tde)                                       # (Np, 1)
    normed = scale_ref[...] * (x * inv_rms)                                    # (Np, D)

    # MLP hot path on the MXU, f32 accumulation.
    h = jnp.dot(normed, w1_ref[...], preferred_element_type=jnp.float32) + b1_ref[...]
    h = jnp.maximum(h, 0.0)
    out_ref[...] = (jnp.dot(h, w2_ref[...], preferred_element_type=jnp.float32)
                    + b2_ref[...])                                             # (Np, Vp)


def prepare_model(params, config):
    """One-time layout prep of every kernel operand (hoisted out of the jitted hot path)."""
    B = config["batch_size"]
    T = config["context_window"]
    D = config["d_model"]
    V = config["vocab_size"]
    Np = ((B * T + _SUBLANE - 1) // _SUBLANE) * _SUBLANE          # 18 -> 24
    Vp = max(_LANE, ((V + _LANE - 1) // _LANE) * _LANE)           # 64 -> 128

    # Lane-dense padded output head (done once, not per forward call).
    w2p = jnp.zeros((D, Vp), jnp.float32).at[:, :V].set(params["w2"])
    b2p = jnp.zeros((1, Vp), jnp.float32).at[:, :V].set(params["b2"])

    # RMSNorm scale tiled along the flattened token axis, zero on padded rows.
    scale_t = jnp.tile(params["rms_scale"][:T, :], (B, 1))                   # (B*T, D)
    scale_p = jnp.zeros((Np, D), jnp.float32).at[:B * T, :].set(scale_t)

    # Same-sample selector matrix.  Padded rows are assigned to the last sample: their
    # embedding is zero so they add nothing, and their own inv_rms stays finite.
    batch_id = jnp.minimum(jnp.arange(Np) // T, B - 1)
    sel = (batch_id[:, None] == batch_id[None, :]).astype(jnp.float32)       # (Np, Np)

    return {
        "emb": params["embedding"].astype(jnp.float32),
        "scale_p": scale_p,
        "sel": sel,
        "w1": params["w1"].astype(jnp.float32),
        "b1": params["b1"].astype(jnp.float32),
        "w2p": w2p,
        "b2p": b2p,
        "dims": (B, T, D, V, Np, Vp),
    }


def prepare_idx(idx, config):
    """Flatten (B, T) -> (Np, 1) int32, padding with id == vocab_size (zero one-hot row)."""
    B = config["batch_size"]
    T = config["context_window"]
    V = config["vocab_size"]
    Np = ((B * T + _SUBLANE - 1) // _SUBLANE) * _SUBLANE
    flat = idx.astype(jnp.int32).reshape(B * T)
    padded = jnp.full((Np,), V, jnp.int32).at[:B * T].set(flat)
    return padded[:, None]


@functools.partial(jax.jit, static_argnames=("dims",))
def _forward_kernel_call(idx_p, emb, scale_p, sel, w1, b1, w2p, b2p, *, dims):
    B, T, D, V, Np, Vp = dims
    kernel = functools.partial(_fused_kernel, inv_tde=1.0 / float(T * D))

    flops = 2 * Np * (V * D + Np * D + D * D + D * Vp)
    bytes_accessed = 4 * (Np + V * D + Np * D + Np * Np
                          + D * D + D + D * Vp + Vp + Np * Vp)

    grid_spec = pltpu.PrefetchScalarGridSpec(
        num_scalar_prefetch=0,
        grid=(1,),   # single step: whole problem (~60 KB) is VMEM resident, no pipelining
        in_specs=[
            pl.BlockSpec((Np, 1), lambda i: (0, 0)),    # idx (flattened, padded)
            pl.BlockSpec((V, D), lambda i: (0, 0)),     # embedding table
            pl.BlockSpec((Np, D), lambda i: (0, 0)),    # rms scale (tiled)
            pl.BlockSpec((Np, Np), lambda i: (0, 0)),   # same-sample selector
            pl.BlockSpec((D, D), lambda i: (0, 0)),     # w1
            pl.BlockSpec((1, D), lambda i: (0, 0)),     # b1
            pl.BlockSpec((D, Vp), lambda i: (0, 0)),    # w2 (lane-padded)
            pl.BlockSpec((1, Vp), lambda i: (0, 0)),    # b2 (lane-padded)
        ],
        out_specs=pl.BlockSpec((Np, Vp), lambda i: (0, 0)),
    )

    out_padded = pl.pallas_call(
        kernel,
        out_shape=jax.ShapeDtypeStruct((Np, Vp), jnp.float32),
        grid_spec=grid_spec,
        compiler_params=pltpu.CompilerParams(
            dimension_semantics=("arbitrary",)),
        cost_estimate=pl.CostEstimate(
            flops=flops, transcendentals=Np, bytes_accessed=bytes_accessed),
    )(idx_p, emb, scale_p, sel, w1, b1, w2p, b2p)

    return out_padded[:B * T, :V].reshape(B, T, V)


def simple_model_rms_forward(idx_p, prepped):
    """idx_p: prepared (Np, 1) token ids -> logits (B, T, vocab_size)."""
    return _forward_kernel_call(
        idx_p, prepped["emb"], prepped["scale_p"], prepped["sel"],
        prepped["w1"], prepped["b1"], prepped["w2p"], prepped["b2p"],
        dims=prepped["dims"])


def init_params(key, config):
    D = config["d_model"]
    V = config["vocab_size"]
    T = config["context_window"]
    k_emb, k_w1, k_b1, k_w2, k_b2 = jax.random.split(key, 5)
    return {
        "embedding": jax.random.normal(k_emb, (V, D), jnp.float32),
        "rms_scale": jnp.ones((T, D), jnp.float32),
        # nn.Linear(d_model, d_model) stored as (in, out) so kernel does x @ W + b
        "w1": jax.random.normal(k_w1, (D, D), jnp.float32) * (1.0 / jnp.sqrt(D)),
        "b1": jax.random.normal(k_b1, (1, D), jnp.float32) * 0.01,
        # nn.Linear(d_model, vocab_size)
        "w2": jax.random.normal(k_w2, (D, V), jnp.float32) * (1.0 / jnp.sqrt(D)),
        "b2": jax.random.normal(k_b2, (1, V), jnp.float32) * 0.01,
    }


def _reference_forward(idx, params, config):
    """Pure-JAX reference reproducing the PyTorch forward semantics."""
    x = jnp.take(params["embedding"], idx, axis=0)                     # (B, T, D)
    T, D = x.shape[1], x.shape[2]
    ff_rms = jnp.linalg.norm(x.reshape(x.shape[0], -1), axis=-1) * (T * D) ** (-0.5)
    raw = x / ff_rms[:, None, None]
    normed = params["rms_scale"][:T, :][None] * raw
    h = jnp.maximum(normed @ params["w1"] + params["b1"][0], 0.0)
    return h @ params["w2"] + params["b2"][0]


# TODO(synk): optional cross-entropy loss branch (targets is not None) is not part of this
# kernel; compute it with jax.nn.log_softmax outside if needed.
# TODO(synk): if this forward is called in a tight loop, amortize further by keeping weights
# VMEM-resident across calls (cross-call semaphore/VMEM-ref futures, pattern P10).

if __name__ == "__main__":
    key = jax.random.PRNGKey(0)
    k_params, k_idx = jax.random.split(key)
    params = init_params(k_params, CONFIG)

    B = CONFIG["batch_size"]
    T = CONFIG["context_window"]
    idx = jax.random.randint(k_idx, (B, T), 0, CONFIG["vocab_size"], dtype=jnp.int32)

    prepped = prepare_model(params, CONFIG)   # one-time layout prep (hoisted out of jit)
    idx_p = prepare_idx(idx, CONFIG)          # hoisted out of the jitted forward

    logits = simple_model_rms_forward(idx_p, prepped)
    logits = jax.block_until_ready(logits)

    ref = _reference_forward(idx, params, CONFIG)
    assert logits.shape == (B, T, CONFIG["vocab_size"])
    assert jnp.allclose(logits, ref, atol=1e-4, rtol=1e-4)

    print("KERNEL_OK")
</pallas_src>

<mosaic_0001>
module attributes {stable_mosaic.version = 11 : i64} {
  func.func @_fused_kernel(%arg0: i32, %arg1: memref<24x1xi32, #tpu.memory_space<vmem>>, %arg2: memref<64x32xf32, #tpu.memory_space<vmem>>, %arg3: memref<24x32xf32, #tpu.memory_space<vmem>>, %arg4: memref<24x24xf32, #tpu.memory_space<vmem>>, %arg5: memref<32x32xf32, #tpu.memory_space<vmem>>, %arg6: memref<1x32xf32, #tpu.memory_space<vmem>>, %arg7: memref<32x128xf32, #tpu.memory_space<vmem>>, %arg8: memref<1x128xf32, #tpu.memory_space<vmem>>, %arg9: memref<24x128xf32, #tpu.memory_space<vmem>>) attributes {dimension_semantics = [#tpu.dimension_semantics<arbitrary>], iteration_bounds = array<i64: 1>, scalar_prefetch = 0 : i64, scratch_operands = 0 : i64, tpu.core_type = #tpu.core_type<tc>, window_params = [{pipeline_mode = #tpu.pipeline_mode<synchronous>, transform_indices = @transform_0, window_bounds = array<i64: 24, 1>}, {pipeline_mode = #tpu.pipeline_mode<synchronous>, transform_indices = @transform_1, window_bounds = array<i64: 64, 32>}, {pipeline_mode = #tpu.pipeline_mode<synchronous>, transform_indices = @transform_2, window_bounds = array<i64: 24, 32>}, {pipeline_mode = #tpu.pipeline_mode<synchronous>, transform_indices = @transform_3, window_bounds = array<i64: 24, 24>}, {pipeline_mode = #tpu.pipeline_mode<synchronous>, transform_indices = @transform_4, window_bounds = array<i64: 32, 32>}, {pipeline_mode = #tpu.pipeline_mode<synchronous>, transform_indices = @transform_5, window_bounds = array<i64: 1, 32>}, {pipeline_mode = #tpu.pipeline_mode<synchronous>, transform_indices = @transform_6, window_bounds = array<i64: 32, 128>}, {pipeline_mode = #tpu.pipeline_mode<synchronous>, transform_indices = @transform_7, window_bounds = array<i64: 1, 128>}, {pipeline_mode = #tpu.pipeline_mode<synchronous>, transform_indices = @transform_8, window_bounds = array<i64: 24, 128>}]} {
    %c0 = arith.constant 0 : index
    %c0_0 = arith.constant 0 : index
    %0 = vector.load %arg1[%c0, %c0_0] : memref<24x1xi32, #tpu.memory_space<vmem>>, vector<24x1xi32>
    %1 = tpu.iota {dimensions = array<i32: 1>} : vector<24x64xi32>
    %2 = vector.broadcast %0 : vector<24x1xi32> to vector<24x64xi32>
    %3 = arith.cmpi eq, %1, %2 : vector<24x64xi32>
    %4 = arith.extui %3 : vector<24x64xi1> to vector<24x64xi32>
    %5 = arith.sitofp %4 : vector<24x64xi32> to vector<24x64xf32>
    %c0_1 = arith.constant 0 : index
    %c0_2 = arith.constant 0 : index
    %6 = vector.load %arg2[%c0_1, %c0_2] : memref<64x32xf32, #tpu.memory_space<vmem>>, vector<64x32xf32>
    %cst = arith.constant dense<0.000000e+00> : vector<24x32xf32>
    %7 = tpu.matmul %5, %6, %cst {dimension_numbers = #tpu.dot_dimension_numbers<[1], [0], [0], [1], [0, 0, 1, 1], [], []>} : vector<24x64xf32>, vector<64x32xf32>, vector<24x32xf32> -> vector<24x32xf32>
    %8 = arith.mulf %7, %7 : vector<24x32xf32>
    %c0_3 = arith.constant 0 : index
    %c0_4 = arith.constant 0 : index
    %9 = vector.load %arg4[%c0_3, %c0_4] : memref<24x24xf32, #tpu.memory_space<vmem>>, vector<24x24xf32>
    %cst_5 = arith.constant dense<0.000000e+00> : vector<24x32xf32>
    %10 = tpu.matmul %9, %8, %cst_5 {dimension_numbers = #tpu.dot_dimension_numbers<[1], [0], [0], [1], [0, 0, 1, 1], [], []>} : vector<24x24xf32>, vector<24x32xf32>, vector<24x32xf32> -> vector<24x32xf32>
    %cst_6 = arith.constant dense<0.000000e+00> : vector<24xf32>
    %11 = vector.multi_reduction <add>, %10, %cst_6 [1] : vector<24x32xf32> to vector<24xf32>
    %12 = vector.shape_cast %11 : vector<24xf32> to vector<24x1xf32>
    %cst_7 = arith.constant 0.00347222225 : f32
    %13 = vector.broadcast %cst_7 : f32 to vector<24x1xf32>
    %14 = arith.mulf %12, %13 : vector<24x1xf32>
    %15 = math.rsqrt %14 : vector<24x1xf32>
    %c0_8 = arith.constant 0 : index
    %c0_9 = arith.constant 0 : index
    %16 = vector.load %arg3[%c0_8, %c0_9] : memref<24x32xf32, #tpu.memory_space<vmem>>, vector<24x32xf32>
    %17 = vector.broadcast %15 : vector<24x1xf32> to vector<24x32xf32>
    %18 = arith.mulf %7, %17 : vector<24x32xf32>
    %19 = arith.mulf %16, %18 : vector<24x32xf32>
    %c0_10 = arith.constant 0 : index
    %c0_11 = arith.constant 0 : index
    %20 = vector.load %arg5[%c0_10, %c0_11] : memref<32x32xf32, #tpu.memory_space<vmem>>, vector<32x32xf32>
    %cst_12 = arith.constant dense<0.000000e+00> : vector<24x32xf32>
    %21 = tpu.matmul %19, %20, %cst_12 {dimension_numbers = #tpu.dot_dimension_numbers<[1], [0], [0], [1], [0, 0, 1, 1], [], []>} : vector<24x32xf32>, vector<32x32xf32>, vector<24x32xf32> -> vector<24x32xf32>
    %c0_13 = arith.constant 0 : index
    %c0_14 = arith.constant 0 : index
    %22 = vector.load %arg6[%c0_13, %c0_14] : memref<1x32xf32, #tpu.memory_space<vmem>>, vector<1x32xf32>
    %23 = vector.broadcast %22 : vector<1x32xf32> to vector<24x32xf32>
    %24 = arith.addf %21, %23 : vector<24x32xf32>
    %cst_15 = arith.constant 0.000000e+00 : f32
    %25 = vector.broadcast %cst_15 : f32 to vector<24x32xf32>
    %26 = arith.maximumf %24, %25 : vector<24x32xf32>
    %c0_16 = arith.constant 0 : index
    %c0_17 = arith.constant 0 : index
    %27 = vector.load %arg7[%c0_16, %c0_17] : memref<32x128xf32, #tpu.memory_space<vmem>>, vector<32x128xf32>
    %cst_18 = arith.constant dense<0.000000e+00> : vector<24x128xf32>
    %28 = tpu.matmul %26, %27, %cst_18 {dimension_numbers = #tpu.dot_dimension_numbers<[1], [0], [0], [1], [0, 0, 1, 1], [], []>} : vector<24x32xf32>, vector<32x128xf32>, vector<24x128xf32> -> vector<24x128xf32>
    %c0_19 = arith.constant 0 : index
    %c0_20 = arith.constant 0 : index
    %29 = vector.load %arg8[%c0_19, %c0_20] : memref<1x128xf32, #tpu.memory_space<vmem>>, vector<1x128xf32>
    %30 = vector.broadcast %29 : vector<1x128xf32> to vector<24x128xf32>
    %31 = arith.addf %28, %30 : vector<24x128xf32>
    %c0_21 = arith.constant 0 : index
    %c0_22 = arith.constant 0 : index
    %32 = vector.load %arg9[%c0_21, %c0_22] : memref<24x128xf32, #tpu.memory_space<vmem>>, vector<24x128xf32>
    tpu.vector_store %arg9[%c0_21, %c0_22], %31 {strides = array<i32>} : memref<24x128xf32, #tpu.memory_space<vmem>>, vector<24x128xf32>,
    return
  }
  func.func @transform_0(%arg0: i32) -> (i32, i32) {
    %c0_i32 = arith.constant 0 : i32
    %c0_i32_0 = arith.constant 0 : i32
    %c0_i32_1 = arith.constant 0 : i32
    return %c0_i32, %c0_i32_0 : i32, i32
  }
  func.func @transform_1(%arg0: i32) -> (i32, i32) {
    %c0_i32 = arith.constant 0 : i32
    %c0_i32_0 = arith.constant 0 : i32
    %c0_i32_1 = arith.constant 0 : i32
    return %c0_i32, %c0_i32_0 : i32, i32
  }
  func.func @transform_2(%arg0: i32) -> (i32, i32) {
    %c0_i32 = arith.constant 0 : i32
    %c0_i32_0 = arith.constant 0 : i32
    %c0_i32_1 = arith.constant 0 : i32
    return %c0_i32, %c0_i32_0 : i32, i32
  }
  func.func @transform_3(%arg0: i32) -> (i32, i32) {
    %c0_i32 = arith.constant 0 : i32
    %c0_i32_0 = arith.constant 0 : i32
    %c0_i32_1 = arith.constant 0 : i32
    return %c0_i32, %c0_i32_0 : i32, i32
  }
  func.func @transform_4(%arg0: i32) -> (i32, i32) {
    %c0_i32 = arith.constant 0 : i32
    %c0_i32_0 = arith.constant 0 : i32
    %c0_i32_1 = arith.constant 0 : i32
    return %c0_i32, %c0_i32_0 : i32, i32
  }
  func.func @transform_5(%arg0: i32) -> (i32, i32) {
    %c0_i32 = arith.constant 0 : i32
    %c0_i32_0 = arith.constant 0 : i32
    %c0_i32_1 = arith.constant 0 : i32
    return %c0_i32, %c0_i32_0 : i32, i32
  }
  func.func @transform_6(%arg0: i32) -> (i32, i32) {
    %c0_i32 = arith.constant 0 : i32
    %c0_i32_0 = arith.constant 0 : i32
    %c0_i32_1 = arith.constant 0 : i32
    return %c0_i32, %c0_i32_0 : i32, i32
  }
  func.func @transform_7(%arg0: i32) -> (i32, i32) {
    %c0_i32 = arith.constant 0 : i32
    %c0_i32_0 = arith.constant 0 : i32
    %c0_i32_1 = arith.constant 0 : i32
    return %c0_i32, %c0_i32_0 : i32, i32
  }
  func.func @transform_8(%arg0: i32) -> (i32, i32) {
    %c0_i32 = arith.constant 0 : i32
    %c0_i32_0 = arith.constant 0 : i32
    %c0_i32_1 = arith.constant 0 : i32
    return %c0_i32, %c0_i32_0 : i32, i32
  }
}

</mosaic_0001>

<bundles_post_ra>
// kernel: _forward_kernel_call.1
= control target key start
LH: loop header
LB: loop body
LE: loop exit
PB: predicated region body
PF: predicated region fallthrough
CT: control target
= control target key end

     0   :  { %v646_v0 = vmov 0   ;;  %v647_v7 = vmov 0.0|0.0   ;;  %vm648_vm0 = vmmov 0   ;;  %v649_v10 = vmov 0.0   ;;  %s848_s0 = inlined_call_operand.vmem [shape: s32[24,1], index: 0, kind: input, shape index: {}]   ;;  %s849_s1 = inlined_call_operand.vmem [shape: f32[64,32], index: 1, kind: input, shape index: {}]   ;;  %s850_s3 = inlined_call_operand.vmem [shape: f32[24,24], index: 3, kind: input, shape index: {}]   ;;  %s851_s4 = inlined_call_operand.vmem [shape: f32[32,32], index: 4, kind: input, shape index: {}]   ;;  %s852_s6 = inlined_call_operand.vmem [shape: f32[32,128], index: 6, kind: input, shape index: {}]   ;;  %s853_s2 = inlined_call_operand.vmem [shape: f32[24,32], index: 2, kind: input, shape index: {}]   ;;  %s854_s5 = inlined_call_operand.vmem [shape: f32[1,32], index: 5, kind: input, shape index: {}]   ;;  %s855_s7 = inlined_call_operand.vmem [shape: f32[1,128], index: 7, kind: input, shape index: {}]   ;;  %s856_s8 = inlined_call_operand.vmem [shape: f32[24,128], index: 8, kind: output, shape index: {}]  }
   0x1   :  { %638 = vset.pattern.permute.xlu0 %v646_v0  ;;  %v29_v1 = vld [vmem:[%s848_s0] sm:$0xff]  ;;  %639 = vset.pattern.permute.xlu1 %v646_v0  ;;  %v31_v2 = vld [vmem:[%s848_s0 + $0x10] sm:$0xff]  ;;  %v53_v4 = vld [vmem:[%s849_s1 + $0x8] sm:$0xff]  ;;  %v32_v18 = vlaneseq  ;;  %vm60_vm1 = vcmask 523264   ;;  %vm156_vm5 = vcmask 195584   ;;  %vm246_vm6 = vcmask 261120  }
   0x2   :  { %35 = vperm.xlu0 %638, %v29_v1   ;;  %41 = vperm.xlu1 %639, %v31_v2   ;;  %v52_v3 = vld [vmem:[%s849_s1] sm:$0xff]  ;;  %v54_v5 = vld [vmem:[%s849_s1 + $0x10] sm:$0xff]  ;;  %v30_v6 = vld [vmem:[%s848_s0 + $0x8] sm:$0xff] }
   0x3   :  { %603 = vmatprep.subr.bf16.mxu0 %v647_v7  ;;  %v604_v8 = vpack.c.bf16 %v53_v4, %v52_v3  ;;  %v55_v9 = vld [vmem:[%s849_s1 + $0x18] sm:$0xff]  ;;  %545 = vmatprep.mubr.msk.f32.mxu0 %vm648_vm0, %v649_v10  ;;  %v56_v12 = vld [vmem:[%s849_s1 + $0x20] sm:$0xff]  ;;  %v57_v13 = vld [vmem:[%s849_s1 + $0x28] sm:$0xff]  ;;  %v33_v19 = vand.u32 127, %v32_v18 }
   0x4   :  { %615 = vmatprep.subr.bf16.mxu1 %v647_v7  ;;  %560 = vmatprep.mubr.msk.f32.mxu1 %vm648_vm0, %v649_v10  ;;  %v607_v11 = vpack.c.bf16 %v55_v9, %v54_v5  ;;  %v610_v14 = vpack.c.bf16 %v57_v13, %v56_v12  ;;  %v58_v15 = vld [vmem:[%s849_s1 + $0x30] sm:$0xff]  ;;  %v59_v16 = vld [vmem:[%s849_s1 + $0x38] sm:$0xff]  ;;  %v153_v36 = vld [vmem:[%s850_s3] sm:$0xff] }
   0x5   :  { %605 = vmatpush3.bf16.msra.mxu0 %v604_v8  ;;  %v613_v17 = vpack.c.bf16 %v59_v16, %v58_v15  ;;  %v154_v37 = vld [vmem:[%s850_s3 + $0x8] sm:$0xff]  ;;  %v155_v38 = vld [vmem:[%s850_s3 + $0x10] sm:$0xff]  ;;  %v271_v48 = vld [vmem:[%s851_s4] sm:$0xff] }
   0x6   :  { %38 = vperm.xlu0 %638, %v30_v6   ;;  %606 = vmatprep.subr.bf16.mxu0 %v647_v7  ;;  %v272_v49 = vld [vmem:[%s851_s4 + $0x8] sm:$0xff]  ;;  %v273_v51 = vld [vmem:[%s851_s4 + $0x10] sm:$0xff]  ;;  %v274_v52 = vld [vmem:[%s851_s4 + $0x18] sm:$0xff] }
   0x7   :  { %v619_v50 = vpack.c.bf16 %v272_v49, %v271_v48  ;;  %v622_v53 = vpack.c.bf16 %v274_v52, %v273_v51  ;;  %v374_v54 = vld [vmem:[%s852_s6] sm:$0xff]  ;;  %v375_v55 = vld [vmem:[%s852_s6 + $0x8] sm:$0xff]  ;;  %v264_v9 = vld [vmem:[%s853_s2 + $0x10] sm:$0xff] }
   0x8   :  { %v625_v56 = vpack.c.bf16 %v375_v55, %v374_v54  ;;  %v262_v0 = vld [vmem:[%s853_s2] sm:$0xff]  ;;  %v263_v4 = vld [vmem:[%s853_s2 + $0x8] sm:$0xff]  ;;  %v377_v13 = vld [vmem:[%s852_s6 + $0x18] sm:$0xff] }
   0x9   :  { %608 = vmatpush3.bf16.msra.mxu0 %v607_v11  ;;  %v490_v15 = vld [vmem:[%s854_s5] ss:$0 sm:$0xff] }
   0xa   :  { %609 = vmatprep.subr.bf16.mxu0 %v647_v7 }
   0xd   :  { %611 = vmatpush3.bf16.msra.mxu0 %v610_v14 }
   0xe   :  { %612 = vmatprep.subr.bf16.mxu0 %v647_v7 }
  0x11   :  { %614 = vmatpush3.bf16.msra.mxu0 %v613_v17 }
  0x12   :  { %624 = vmatprep.subr.bf16.mxu0 %v647_v7 }
  0x81   :  { %v36_v20 = vpop.permute.xlu0 %35  ;;  %v42_v22 = vpop.permute.xlu1 %41 }
  0x82   :  { %vm43_vm2 = vcmp.eq.s32.totalorder %v33_v19, %v36_v20  ;;  %vm45_vm4 = vcmp.eq.s32.totalorder %v33_v19, %v42_v22 }
  0x83   :  { %v481_v21 = vsel %vm43_vm2, 1.0, %v649_v10  ;;  %v483_v25 = vsel %vm45_vm4, 1.0, %v649_v10 }
  0x84   :  { %546 = vmatmul.mubr.msk.f32.vlgmr.msra.gmra.mrb[0].mxu0 %vm60_vm1, %v481_v21 }
  0x85   :  { %v39_v23 = vpop.permute.xlu0 %38  ;;  %548 = vmatprep.mubr.msk.f32.mxu0 %vm648_vm0, %v649_v10  ;;  %626 = vmatpush3.bf16.msra.mxu0 %v625_v56 }
  0x86   :  { %vm44_vm3 = vcmp.eq.s32.totalorder %v33_v19, %v39_v23  ;;  %627 = vmatprep.subr.bf16.mxu0 %v647_v7 }
  0x87   :  { %v482_v24 = vsel %vm44_vm3, 1.0, %v649_v10 }
  0x88   :  { %549 = vmatmul.mubr.msk.f32.gmra.mrb[2].mxu0 %vm60_vm1, %v482_v24 }
  0x89   :  { %551 = vmatprep.mubr.msk.f32.mxu0 %vm648_vm0, %v649_v10 }
  0x8c   :  { %552 = vmatmul.mubr.msk.f32.gmra.mrb[4].mxu0 %vm60_vm1, %v483_v25 }
  0x8d   :  { %594 = vmatprep.mubr.msk.f32.mxu0 %vm648_vm0, %v649_v10 }
 0x157   :  { %v747_v26 = vpop.f32.mrb[0].mxu0 }
 0x158   :  { %v547_v27 = vpop.f32.mrb[1].mxu0  ;;  %v150_v29 = vmul.f32 %v747_v26, %v747_v26 }
 0x15b   :  { %v749_v28 = vpop.f32.mrb[2].mxu0 }
 0x15c   :  { %v151_v30 = vmul.f32 %v749_v28, %v749_v28  ;;  %v550_v31 = vpop.f32.mrb[3].mxu0 }
 0x15e   :  { %v616_v32 = vpack.c.bf16 %v151_v30, %v150_v29 }
 0x15f   :  { %v755_v33 = vpop.f32.mrb[4].mxu0 }
 0x160   :  { %v152_v34 = vmul.f32 %v755_v33, %v755_v33  ;;  %617 = vmatpush3.bf16.msra.mxu1 %v616_v32  ;;  %v553_v35 = vpop.f32.mrb[5].mxu0 }
 0x161   :  { %558 = vmatprep.subr.mxu1 %v649_v10 }
 0x164   :  { %559 = vmatpush3.msra.mxu1 %v152_v34 }
 0x165   :  { %561 = vmatmul.mubr.msk.f32.vlgmr.msra.gmra.mrb[0].mxu1 %vm156_vm5, %v153_v36  ;;  %618 = vmatprep.subr.bf16.mxu1 %v647_v7 }
 0x166   :  { %563 = vmatprep.mubr.msk.f32.mxu1 %vm648_vm0, %v649_v10  ;;  %620 = vmatpush3.bf16.msra.mxu1 %v619_v50 }
 0x167   :  { %621 = vmatprep.subr.bf16.mxu1 %v647_v7 }
 0x169   :  { %564 = vmatmul.mubr.msk.f32.gmra.mrb[2].mxu1 %vm156_vm5, %v154_v37 }
 0x16a   :  { %566 = vmatprep.mubr.msk.f32.mxu1 %vm648_vm0, %v649_v10  ;;  %623 = vmatpush3.bf16.msra.mxu1 %v622_v53 }
 0x16b   :  { %630 = vmatprep.subr.bf16.mxu1 %v647_v7 }
 0x16d   :  { %567 = vmatmul.mubr.msk.f32.gmra.mrb[4].mxu1 %vm156_vm5, %v155_v38 }
 0x16e   :  { %577 = vmatprep.mubr.msk.f32.mxu1 %vm648_vm0, %v649_v10 }
 0x238   :  { %v232_v39 = vpop.f32.mrb[0].mxu1 }
 0x239   :  { %v562_v40 = vpop.f32.mrb[1].mxu1  ;;  %v247_v41 = vsel %vm246_vm6, %v232_v39, 0.0 }
 0x23a   :  { %248 = vadd.xlane.f32.xlu1 %v247_v41 }
 0x23c   :  { %v237_v42 = vpop.f32.mrb[2].mxu1 }
 0x23d   :  { %v565_v43 = vpop.f32.mrb[3].mxu1  ;;  %v250_v44 = vsel %vm246_vm6, %v237_v42, 0.0 }
 0x23e   :  { %251 = vadd.xlane.f32.xlu0 %v250_v44 }
 0x240   :  { %v242_v45 = vpop.f32.mrb[4].mxu1 }
 0x241   :  { %v568_v46 = vpop.f32.mrb[5].mxu1  ;;  %v253_v47 = vsel %vm246_vm6, %v242_v45, 0.0 }
 0x242   :  { %254 = vadd.xlane.f32.xlu0 %v253_v47 }
 0x2c7   :  { %v249_v57 = vpop.xlane.xlu1 %248 }
 0x2c8   :  { %v256_v58 = vmul.f32 0.0034722222, %v249_v57 }
 0x2ca   :  { %640 = vrsqrt.f32 %v256_v58 }
 0x2cb   :  { %v252_v59 = vpop.xlane.xlu0 %251 }
 0x2cc   :  { %v257_v60 = vmul.f32 0.0034722222, %v252_v59 }
 0x2ce   :  { %642 = vrsqrt.f32 %v257_v60 }
 0x2cf   :  { %v255_v61 = vpop.xlane.xlu0 %254 }
 0x2d0   :  { %v258_v62 = vmul.f32 0.0034722222, %v255_v61 }
 0x2d2   :  { %644 = vrsqrt.f32 %v258_v62 }
 0x2d4   :  { %v641_v63 = vpop.eup %640 }
 0x2d5   :  { %v265_v1 = vmul.f32 %v641_v63, %v747_v26 }
 0x2d7   :  { %v268_v2 = vmul.f32 %v265_v1, %v262_v0 }
 0x2d8   :  { %v643_v3 = vpop.eup %642 }
 0x2d9   :  { %578 = vmatmul.mubr.msk.f32.vlgmr.msra.gmra.mrb[6].mxu1 %vm246_vm6, %v268_v2  ;;  %v266_v5 = vmul.f32 %v643_v3, %v749_v28  ;;  %v494_v28 = vld [vmem:[%s855_s7] ss:$0 sm:$0xff] }
 0x2da   :  { %580 = vmatprep.mubr.msk.f32.mxu1 %vm648_vm0, %v649_v10  ;;  %632 = vmatpush3.bf16.msra.mxu1 %v625_v56 }
 0x2db   :  { %v269_v6 = vmul.f32 %v266_v5, %v263_v4  ;;  %631 = vmatprep.subr.bf16.mxu1 %v647_v7  ;;  %v376_v7 = vld [vmem:[%s852_s6 + $0x10] sm:$0xff] }
 0x2dc   :  { %v645_v8 = vpop.eup %644  ;;  %v628_v14 = vpack.c.bf16 %v377_v13, %v376_v7 }
 0x2dd   :  { %581 = vmatmul.mubr.msk.f32.gmra.mrb[8].mxu1 %vm246_vm6, %v269_v6  ;;  %v267_v11 = vmul.f32 %v645_v8, %v755_v33 }
 0x2de   :  { %583 = vmatprep.mubr.msk.f32.mxu1 %vm648_vm0, %v649_v10  ;;  %629 = vmatpush3.bf16.msra.mxu0 %v628_v14 }
 0x2df   :  { %v270_v12 = vmul.f32 %v267_v11, %v264_v9  ;;  %633 = vmatpush3.bf16.msra.mxu1 %v628_v14 }
 0x2e1   :  { %584 = vmatmul.mubr.msk.f32.gmra.mrb[10].mxu1 %vm246_vm6, %v270_v12 }
 0x2e2   :  { %600 = vmatprep.mubr.msk.f32.mxu1 %vm648_vm0, %v649_v10 }
 0x3ac   :  { %v357_v16 = vpop.f32.mrb[6].mxu1 }
 0x3ad   :  { %v358_v17 = vadd.f32 %v490_v15, %v357_v16  ;;  %v579_v18 = vpop.f32.mrb[7].mxu1 }
 0x3af   :  { %v371_v19 = vmax.f32 %v358_v17, 0.0 }
 0x3b0   :  { %v362_v20 = vpop.f32.mrb[8].mxu1 }
 0x3b1   :  { %v363_v21 = vadd.f32 %v490_v15, %v362_v20  ;;  %v582_v22 = vpop.f32.mrb[9].mxu1  ;;  %595 = vmatmul.mubr.msk.f32.vlgmr.msra.gmra.mrb[6].mxu0 %vm246_vm6, %v371_v19 }
 0x3b2   :  { %597 = vmatprep.mubr.msk.f32.mxu0 %vm648_vm0, %v649_v10 }
 0x3b3   :  { %v372_v23 = vmax.f32 %v363_v21, 0.0 }
 0x3b4   :  { %v367_v24 = vpop.f32.mrb[10].mxu1 }
 0x3b5   :  { %v368_v25 = vadd.f32 %v490_v15, %v367_v24  ;;  %v585_v26 = vpop.f32.mrb[11].mxu1  ;;  %598 = vmatmul.mubr.msk.f32.gmra.mrb[8].mxu0 %vm246_vm6, %v372_v23 }
 0x3b7   :  { %v373_v27 = vmax.f32 %v368_v25, 0.0 }
 0x3b9   :  { %601 = vmatmul.mubr.msk.f32.vlgmr.msra.gmra.mrb[12].mxu1 %vm246_vm6, %v373_v27 }
 0x484   :  { %v460_v29 = vpop.f32.mrb[6].mxu0 }
 0x485   :  { %v461_v30 = vadd.f32 %v494_v28, %v460_v29  ;;  %v596_v31 = vpop.f32.mrb[7].mxu0 }
 0x487   :  { %474 = vst [vmem:[%s856_s8] sm:$0xff] %v461_v30 }
 0x488   :  { %v465_v10 = vpop.f32.mrb[8].mxu0 }
 0x489   :  { %v466_v32 = vadd.f32 %v494_v28, %v465_v10  ;;  %v599_v33 = vpop.f32.mrb[9].mxu0 }
 0x48b   :  { %475 = vst [vmem:[%s856_s8 + $0x8] sm:$0xff] %v466_v32 }
 0x48c   :  { %v470_v34 = vpop.f32.mrb[12].mxu1 }
 0x48d   :  { %v471_v35 = vadd.f32 %v494_v28, %v470_v34  ;;  %v602_v36 = vpop.f32.mrb[13].mxu1 }
 0x48f   :  { %476 = vst [vmem:[%s856_s8 + $0x10] sm:$0xff] %v471_v35 }

</bundles_post_ra>
